<compile_context>
chip_gen: v7x
topology: tpu7x:2x2x1
jax: 0.10.0
libtpu: 0.0.40
codegen_flags: <defaults>
</compile_context>

<pallas_src>
import jax
import jax.numpy as jnp
from jax.experimental import pallas as pl
from jax.experimental.pallas import tpu as pltpu


def _make_spmm_kernel(tk: int, h_resident: bool, compute_dtype):
    """Kernel over grid (i: output-row tiles, k: reduction tiles)."""

    def kernel(adj_ref, h_ref, o_ref, acc_ref):
        k = pl.program_id(1)
        nk = pl.num_programs(1)

        # f32 VMEM scratch is the accumulator; zero it at the start of each
        # reduction sweep (k is the innermost grid axis).
        @pl.when(k == 0)
        def _():
            acc_ref[...] = jnp.zeros_like(acc_ref)

        if h_resident:
            # h lives fully in VMEM; slice the current reduction chunk.
            start = pl.multiple_of(k * tk, tk)
            h_blk = h_ref[pl.ds(start, tk), :]
        else:
            h_blk = h_ref[...]

        # In-kernel bf16 cast (VPU, hidden under the adj DMA) + MXU dot with
        # f32 accumulation.
        acc_ref[...] += jnp.dot(
            adj_ref[...].astype(compute_dtype),
            h_blk.astype(compute_dtype),
            preferred_element_type=jnp.float32,
        )

        # Write the output once, in its final dtype, on the last k step.
        @pl.when(k == nk - 1)
        def _():
            o_ref[...] = acc_ref[...].astype(o_ref.dtype)

    return kernel


def _vmem_capacity_bytes() -> int:
    """Generation-aware VMEM capacity; conservative fallback if unavailable."""
    try:
        cap = getattr(pltpu.get_tpu_info(), "vmem_capacity_bytes", None)
        if cap:
            return int(cap)
    except Exception:
        pass
    return 64 * 1024 * 1024  # v7x per-TensorCore VMEM (the smallest of the gens)


def _pick_tm(N: int, F: int, out_itemsize: int, usable: int) -> int:
    if N % 128 != 0:
        # Unaligned node count: full-dim block is a valid block shape.
        return N
    tm = None
    # Prefer >= 2 row tiles (megacore sharding on v7x) while keeping tiles as
    # large as possible (amortize grid-step overhead, cut streamed-h refetch).
    for c in (1024, 512, 256, 128):
        if N % c == 0 and N // c >= 2:
            tm = c
            break
    if tm is None:
        tm = N  # N == 128
    # Keep out double-buffer + f32 accumulator within half of the VMEM budget.
    while tm >= 256 and N % (tm // 2) == 0 and \
            (2 * tm * F * out_itemsize + tm * F * 4) > usable // 2:
        tm //= 2
    return tm


def _pick_tk(K: int, tm: int, F: int, adj_itemsize: int, h_itemsize: int,
             h_resident: bool, adj_budget: int) -> int:
    if K % 128 != 0:
        return K
    # Largest reduction tile that keeps the double-buffered adj block (plus a
    # streamed h block, if h is not resident) within the remaining VMEM budget.
    for c in (4096, 2048, 1024, 512, 256, 128):
        if K % c != 0:
            continue
        cost = 2 * tm * c * adj_itemsize
        if not h_resident:
            cost += 2 * c * F * h_itemsize
        if cost <= adj_budget:
            return c
    return 128


def sgconv_forward(adj: jax.Array, h: jax.Array, *, compute_dtype=jnp.bfloat16):
    """out = adj @ h (the SGConv.forward hot path) via a tiled Pallas matmul."""
    N, K = adj.shape
    K2, F = h.shape
    assert K == K2, "adj.shape[1] must equal h.shape[0]"

    adj_itemsize = jnp.dtype(adj.dtype).itemsize
    h_itemsize = jnp.dtype(h.dtype).itemsize
    out_dtype = h.dtype
    out_itemsize = jnp.dtype(out_dtype).itemsize

    # ---- generation-aware VMEM budget ---------------------------------------
    vmem_cap = _vmem_capacity_bytes()
    usable = min(int(vmem_cap * 3 // 4), 100 * 1024 * 1024)

    # ---- tile selection ------------------------------------------------------
    tm = _pick_tm(N, F, out_itemsize, usable)

    # Keep h fully VMEM-resident (one DMA total) when it fits the budget
    # (double-buffering of the constant-index block is accounted for).
    h_foot = 2 * K * F * h_itemsize
    h_resident = h_foot <= usable // 3

    out_foot = 2 * tm * F * out_itemsize + tm * F * 4  # out blocks + f32 acc
    adj_budget = usable - out_foot - (h_foot if h_resident else 0)
    if adj_budget < 2 * tm * 128 * adj_itemsize:
        # Not enough room for even the smallest adj tile with resident h.
        h_resident = False
        adj_budget = usable - out_foot

    tk = _pick_tk(K, tm, F, adj_itemsize, h_itemsize, h_resident, adj_budget)

    grid = (N // tm, K // tk)

    if h_resident:
        h_spec = pl.BlockSpec((K, F), lambda i, k: (0, 0))
    else:
        h_spec = pl.BlockSpec((tk, F), lambda i, k: (k, 0))

    out = pl.pallas_call(
        _make_spmm_kernel(tk, h_resident, compute_dtype),
        out_shape=jax.ShapeDtypeStruct((N, F), out_dtype),
        grid_spec=pltpu.PrefetchScalarGridSpec(
            num_scalar_prefetch=0,
            grid=grid,
            in_specs=[
                pl.BlockSpec((tm, tk), lambda i, k: (i, k)),  # adj tile (native dtype)
                h_spec,                                       # h (resident or streamed)
            ],
            out_specs=pl.BlockSpec((tm, F), lambda i, k: (i, 0)),
            scratch_shapes=[pltpu.VMEM((tm, F), jnp.float32)],
        ),
        compiler_params=pltpu.CompilerParams(
            # i-axis parallel -> shards across the 2 TensorCores on v7x.
            dimension_semantics=("parallel", "arbitrary"),
            vmem_limit_bytes=int(usable),
        ),
    )(adj, h)

    return out


if __name__ == "__main__":
    # Small deterministic synthetic graph: N nodes, F = input_dim features.
    # (SGConv has no weights in forward; input_dim/output_dim are metadata.)
    N = 256   # number of nodes
    F = 128   # feature dim (== input_dim of the module)

    key = jax.random.PRNGKey(0)
    k_adj, k_h = jax.random.split(key)

    # Synthetic sparse-ish adjacency: ~5% density + self-loops, row-normalized,
    # materialized densely for the TPU matmul.
    dense_rand = jax.random.uniform(k_adj, (N, N), dtype=jnp.float32)
    adj = (dense_rand < 0.05).astype(jnp.float32) + jnp.eye(N, dtype=jnp.float32)
    adj = adj / jnp.sum(adj, axis=1, keepdims=True)

    h = jax.random.normal(k_h, (N, F), dtype=jnp.float32)

    out = sgconv_forward(adj, h)
    out = jax.block_until_ready(out)

    # Reference: plain f32 XLA matmul (spmm semantics).  The kernel computes in
    # bf16 on the MXU with f32 accumulation, so use a bf16-appropriate tolerance.
    ref = adj @ h
    assert out.shape == (N, F)
    assert out.dtype == h.dtype
    assert jnp.allclose(out, ref, atol=5e-2, rtol=5e-2)

    print("KERNEL_OK")
</pallas_src>

<mosaic_0001>
module attributes {stable_mosaic.version = 11 : i64} {
  func.func @kernel(%arg0: i32, %arg1: i32, %arg2: memref<128x256xf32, #tpu.memory_space<vmem>>, %arg3: memref<256x128xf32, #tpu.memory_space<vmem>>, %arg4: memref<128x128xf32, #tpu.memory_space<vmem>>, %arg5: memref<128x128xf32, #tpu.memory_space<vmem>>) attributes {dimension_semantics = [#tpu.dimension_semantics<parallel>, #tpu.dimension_semantics<arbitrary>], iteration_bounds = array<i64: 2, 1>, scalar_prefetch = 0 : i64, scratch_operands = 1 : i64, tpu.core_type = #tpu.core_type<tc>, window_params = [{transform_indices = @transform_0, window_bounds = array<i64: 128, 256>}, {pipeline_mode = #tpu.pipeline_mode<synchronous>, transform_indices = @transform_1, window_bounds = array<i64: 256, 128>}, {transform_indices = @transform_2, window_bounds = array<i64: 128, 128>}]} {
    %c0_i32 = arith.constant 0 : i32
    %0 = arith.cmpi eq, %arg1, %c0_i32 : i32
    %1 = arith.extui %0 : i1 to i32
    %c0_i32_0 = arith.constant 0 : i32
    %2 = arith.cmpi ne, %1, %c0_i32_0 : i32
    scf.if %2 {
      %cst_9 = arith.constant 0.000000e+00 : f32
      %17 = vector.broadcast %cst_9 : f32 to vector<128x128xf32>
      %c0_10 = arith.constant 0 : index
      %c0_11 = arith.constant 0 : index
      %18 = vector.load %arg5[%c0_10, %c0_11] : memref<128x128xf32, #tpu.memory_space<vmem>>, vector<128x128xf32>
      tpu.vector_store %arg5[%c0_10, %c0_11], %17 {strides = array<i32>} : memref<128x128xf32, #tpu.memory_space<vmem>>, vector<128x128xf32>,
    } else {
    }
    %c256_i32 = arith.constant 256 : i32
    %3 = arith.muli %arg1, %c256_i32 : i32
    %4 = tpu.assume_multiple %3, 256 : i32
    %5 = arith.index_cast %4 : i32 to index
    %c0 = arith.constant 0 : index
    %6 = vector.load %arg3[%5, %c0] : memref<256x128xf32, #tpu.memory_space<vmem>>, vector<256x128xf32>
    %c0_1 = arith.constant 0 : index
    %c0_2 = arith.constant 0 : index
    %7 = vector.load %arg5[%c0_1, %c0_2] : memref<128x128xf32, #tpu.memory_space<vmem>>, vector<128x128xf32>
    %c0_3 = arith.constant 0 : index
    %c0_4 = arith.constant 0 : index
    %8 = vector.load %arg2[%c0_3, %c0_4] : memref<128x256xf32, #tpu.memory_space<vmem>>, vector<128x256xf32>
    %9 = arith.truncf %8 : vector<128x256xf32> to vector<128x256xbf16>
    %10 = arith.truncf %6 : vector<256x128xf32> to vector<256x128xbf16>
    %cst = arith.constant dense<0.000000e+00> : vector<128x128xf32>
    %11 = tpu.matmul %9, %10, %cst {dimension_numbers = #tpu.dot_dimension_numbers<[1], [0], [0], [1], [0, 0, 1, 1], [], []>} : vector<128x256xbf16>, vector<256x128xbf16>, vector<128x128xf32> -> vector<128x128xf32>
    %12 = arith.addf %7, %11 : vector<128x128xf32>
    %c0_5 = arith.constant 0 : index
    %c0_6 = arith.constant 0 : index
    %13 = vector.load %arg5[%c0_5, %c0_6] : memref<128x128xf32, #tpu.memory_space<vmem>>, vector<128x128xf32>
    tpu.vector_store %arg5[%c0_5, %c0_6], %12 {strides = array<i32>} : memref<128x128xf32, #tpu.memory_space<vmem>>, vector<128x128xf32>,
    %c0_i32_7 = arith.constant 0 : i32
    %14 = arith.cmpi eq, %arg1, %c0_i32_7 : i32
    %15 = arith.extui %14 : i1 to i32
    %c0_i32_8 = arith.constant 0 : i32
    %16 = arith.cmpi ne, %15, %c0_i32_8 : i32
    scf.if %16 {
      %c0_9 = arith.constant 0 : index
      %c0_10 = arith.constant 0 : index
      %17 = vector.load %arg5[%c0_9, %c0_10] : memref<128x128xf32, #tpu.memory_space<vmem>>, vector<128x128xf32>
      %c0_11 = arith.constant 0 : index
      %c0_12 = arith.constant 0 : index
      %18 = vector.load %arg4[%c0_11, %c0_12] : memref<128x128xf32, #tpu.memory_space<vmem>>, vector<128x128xf32>
      tpu.vector_store %arg4[%c0_11, %c0_12], %17 {strides = array<i32>} : memref<128x128xf32, #tpu.memory_space<vmem>>, vector<128x128xf32>,
    } else {
    }
    return
  }
  func.func @transform_0(%arg0: i32, %arg1: i32) -> (i32, i32) {
    %c0_i32 = arith.constant 0 : i32
    return %arg0, %arg1 : i32, i32
  }
  func.func @transform_1(%arg0: i32, %arg1: i32) -> (i32, i32) {
    %c0_i32 = arith.constant 0 : i32
    %c0_i32_0 = arith.constant 0 : i32
    %c0_i32_1 = arith.constant 0 : i32
    return %c0_i32, %c0_i32_0 : i32, i32
  }
  func.func @transform_2(%arg0: i32, %arg1: i32) -> (i32, i32) {
    %c0_i32 = arith.constant 0 : i32
    %c0_i32_0 = arith.constant 0 : i32
    return %arg0, %c0_i32 : i32, i32
  }
}

</mosaic_0001>

<bundles_post_ra>
// kernel: tpu_custom_call.1
= control target key start
LH: loop header
LB: loop body
LE: loop exit
PB: predicated region body
PF: predicated region fallthrough
CT: control target
= control target key end

     0   :  { %7 = vsyncpa [#allocation4], 0  ;;  %s1229_s0 = inlined_call_operand.hbm [shape: f32[256,256], index: 0, kind: input, shape index: {}]   ;;  %s1230_s1 = inlined_call_operand.hbm [shape: f32[256,128], index: 1, kind: input, shape index: {}]   ;;  %s1231_s2 = inlined_call_operand.hbm [shape: f32[256,128], index: 2, kind: output, shape index: {}]  }
   0x1   :  { %9 = vsyncpa [#allocation4 + $0x1], 0 }
   0x2   :  { %10 = vsyncpa [#allocation7], 0 }
   0x3   :  { %11 = vsyncpa [#allocation5], 0 }
   0x4   :  { %13 = vsyncpa [#allocation5 + $0x1], 0  ;;  %s956_s9 = smov 0   ;;  %s958_s10 = smov 0  }
   0x5   :  { %s960_s11 = smov 0   ;;  %s962_s12 = smov 0  }
   0x6   :  { %s964_s13 = smov 0   ;;  %s966_s14 = smov 0  }
   0x7 LB: > { %s606_s15 = sadd.s32 4294967295, %s930_s14   ;;  %s607_s16 = sadd.s32 4294967294, %s930_s14   ;;  %s930_s14 = sphi %s966_s14, %s19_s14   ;;  %s926_s13 = sphi %s964_s13, %s1255_s13   ;;  %s922_s12 = sphi %s962_s12, %s1254_s12   ;;  %s918_s11 = sphi %s960_s11, %s1253_s11   ;;  %s914_s10 = sphi %s958_s10, %s1252_s10   ;;  %s910_s9 = sphi %s956_s9, %s1251_s9  }
   0x8   : > { %p53_p0 = scmp.ne.s32.totalorder %s914_s10, %s910_s9  ;;  %p990_p1 = scmp.eq.s32.totalorder %s606_s15, 0 }
   0x9   : > { %p994_p2 = scmp.eq.s32.totalorder %s606_s15, 1  ;;  %p104_p3 = scmp.eq.s32.totalorder %s607_s16, 1 }
   0xa   : > { %s1236_s17 = scalar_select %p990_p1, 1, 0 }
   0xb   : > { %s1237_s18 = scalar_select %p994_p2, 1, 0 }
   0xc   : > { %p1000_p4 = por %p990_p1, %p53_p0  ;;  %p608_p5 = scmp.ge.s32.totalorder %s930_s14, 1 }
   0xd   : > { %p1005_p6 = por %p104_p3, %p53_p0  ;;  %p111_p7 = scmp.lt.s32.totalorder %s930_s14, 3 }
   0xe   : > { %s1238_s19 = scalar_select %p1000_p4, 1, 0 }
   0xf   : > { %s1239_s20 = scalar_select %p1005_p6, 1, 0 }
  0x10   : > { %p1010_p8 = pnand %p608_p5, %p111_p7  ;;  %s932_s22 = smov [#allocation6]  }
  0x11   : > { %s123_s23 = sshll.u32 %s932_s22, 4  ;;  %s31_s25 = sadd.s32 1, %s926_s13  ;;  %s124_s23 = int_to_ptr.vmem [resolvable:$true] %s123_s23 }
  0x12   : > { %s1240_s21 = scalar_select %p1010_p8, 1, 0 }
  0x13   : > { %p715_p9 = pneg %p1010_p8  ;;  %s786_s28 = scalar_lea.hbm %s1230_s1, 4096 }
  0x14   : > { %p787_p12 = scmp.ne.s32.totalorder %s1230_s1, %s786_s28  ;;  %p793_p5 = scmp.lt.u32.totalorder %s786_s28, %s1230_s1 }
  0x15   : > { %p1019_p11 = pnand %p715_p9, %p990_p1 }
  0x17   : > { %p788_p13 = pneg %p1019_p11 }
  0x19   : > { %p789_p0 = pnand %p788_p13, %p787_p12 }
  0x1b   : > { %p790_p3 = pneg %p789_p0 }
  0x1d   : > { %p795_p7 = pnand %p793_p5, %p790_p3 }
  0x1f   : > { %798 = shalt.err (!%p795_p7)
}
  0x20   : > { %s799_s5 = scalar_lea.vmem %s124_s23, 4096  ;;  %p807_p1 = scmp.lt.s32.totalorder %s124_s23, %s124_s23 }
  0x21   : > { %p800_p9 = scmp.ne.s32.totalorder %s124_s23, %s799_s5  ;;  %p808_p4 = scmp.lt.s32.totalorder %s799_s5, %s799_s5 }
  0x23   : > { %p802_p10 = pnand %p800_p9, %p788_p13  ;;  %p809_p8 = por %p808_p4, %p807_p1 }
  0x25   : > { %p803_p6 = pneg %p802_p10 }
  0x27   : > { %p810_p2 = pnand %p809_p8, %p803_p6 }
  0x29   : > { %813 = shalt.err (!%p810_p2)
}
  0x2a   : > { %s933_s6 = smov 128   ;;  %s934_s7 = smov 8  }
  0x2b   : > { %718 = dma.hbm_to_vmem [thread:$0]  (!%p1019_p11), %s1230_s1, 4096, %s124_s23, [#allocation7], %s933_s6, %s933_s6, %s934_s7  }
  0x2c   : > { %p33_p1 = scmp.ge.s32.totalorder %s31_s25, 2  ;;  %s40_s16 = sadd.s32 1, %s918_s11 }
  0x2d   : > { %p47_p2 = scmp.ne.s32.totalorder %s918_s11, %s914_s10  ;;  %p48_p4 = scmp.eq.s32.totalorder %s930_s14, 0 }
  0x2e   : > { %s1257_s25 = smov (%p33_p1, %s31_s25), 0  ;;  %p1243_p8 = scmp.ne.s32.totalorder %s1237_s18, 0 }
  0x2f   : > { %p1046_p6 = por %p48_p4, %p47_p2  ;;  %s35_s24 = ssub.s32 %s926_s13, %s1257_s25 }
  0x30   : > { %p1052_p10 = por %p1243_p8, %p47_p2  ;;  %p728_p12 = scmp.lt.s32.totalorder %s930_s14, 2 }
  0x31   : > { %p38_p11 = scmp.eq.s32.totalorder %s35_s24, 0  ;;  %s137_s23 = sand.u32 1, %s918_s11  }
  0x32   : > { %s611_s27 = sshll.u32 %s137_s23, 8  ;;  %s625_s29 = sshll.u32 %s926_s13, 12 }
  0x33   : > { %s1061_s28 = scalar_select %p38_p11, %s918_s11, %s40_s16  }
  0x34   : > { %s1067_s4 = scalar_lea.hbm %s1229_s0, %s625_s29  ;;  %s141_s18 = scalar_lea.vmem [#allocation3], %s611_s27 }
  0x35   : > { %s151_s5 = sshll.u32 %s141_s18, 4  ;;  %p1073_p13 = pnand %p728_p12, %p1046_p6  ;;  %s1069_s5 = int_to_ptr.vmem [resolvable:$true] %s151_s5 }
  0x36   : > { %s1077_s7 = scalar_lea.sflag [#allocation4], %s137_s23  ;;  %s814_s8 = scalar_lea.hbm %s1067_s4, 4096 }
  0x37   : > { %p815_p0 = scmp.ne.s32.totalorder %s1067_s4, %s814_s8  ;;  %p816_p3 = pneg %p1073_p13 }
  0x38   : > { %s819_s22 = scalar_lea.hbm %s1229_s0, 8192  ;;  %p820_p9 = scmp.lt.u32.totalorder %s1067_s4, %s1229_s0 }
  0x39   : > { %p817_p5 = pnand %p816_p3, %p815_p0  ;;  %p821_p1 = scmp.lt.u32.totalorder %s819_s22, %s814_s8 }
  0x3a   : > { %p823_p4 = scmp.lt.u32.totalorder %s814_s8, %s1067_s4 }
  0x3b   : > { %p818_p7 = pneg %p817_p5  ;;  %p822_p2 = por %p821_p1, %p820_p9 }
  0x3d   : > { %p824_p6 = por %p823_p4, %p822_p2 }
  0x3f   : > { %p825_p8 = pnand %p824_p6, %p818_p7 }
  0x41   : > { %828 = shalt.err (!%p825_p8)
}
  0x42   : > { %s829_s23 = scalar_lea.vmem %s1069_s5, 4096  ;;  %s935_s29 = smov [#allocation3]  }
  0x43   : > { %p830_p12 = scmp.ne.s32.totalorder %s1069_s5, %s829_s23  ;;  %s834_s30 = sshll.u32 %s935_s29, 4  ;;  %s835_s30 = int_to_ptr.vmem [resolvable:$false] %s834_s30 }
  0x44   : > { %s836_s3 = scalar_lea.vmem %s835_s30, 8192  ;;  %p837_p5 = scmp.lt.s32.totalorder %s1069_s5, %s835_s30 }
  0x45   : > { %p832_p11 = pnand %p830_p12, %p816_p3  ;;  %p838_p9 = scmp.lt.s32.totalorder %s836_s3, %s829_s23 }
  0x47   : > { %p833_p0 = pneg %p832_p11  ;;  %p839_p1 = por %p838_p9, %p837_p5 }
  0x49   : > { %p840_p2 = pnand %p839_p1, %p833_p0 }
  0x4b   : > { %843 = shalt.err (!%p840_p2)
}
  0x4c   : > { %s936_s18 = smov 256   ;;  %s937_s8 = smov 16  }
  0x4d   : > { %722 = dma.hbm_to_vmem [thread:$0]  (!%p1073_p13), %s1067_s4, 4096, %s1069_s5, %s1077_s7, %s936_s18, %s936_s18, %s937_s8  }
  0x4e   : > { %p1246_p3 = scmp.ne.s32.totalorder %s1240_s21, 0 }
  0x4f   : > { %s1108_s15 = sand.u32 (!%p1246_p3), 1, %s914_s10   ;;  %p1247_p7 = scmp.ne.s32.totalorder (!%p1246_p3), %s1238_s19, 0 }
  0x50   : > { %163 = sbr.rel (%p1246_p3) target bundleno = 382 (0x17e), region = 28  ;;  %s616_s16 = sshll.u32 (!%p1246_p3), %s1108_s15, 8 }
  0x51   : > { %s166_s22 = scalar_lea.sflag (!%p1246_p3), [#allocation4], %s1108_s15  ;;  %s1112_s24 = scalar_lea.vmem (!%p1246_p3), [#allocation3], %s616_s16 }
  0x57   : > { %897 = dma.done.wait (%p1247_p7), %s166_s22, 4096  }
  0x58   : > { %899 = vsyncadd (%p1247_p7), %s166_s22, 4294963200  ;;  %p1248_p13 = scmp.ne.s32.totalorder %s1236_s17, 0 }
  0x5a   : > { %901 = dma.done.wait (%p1248_p13), [#allocation7], 4096  }
  0x5b   : > { %903 = vsyncadd (%p1248_p13), [#allocation7], 4294963200  ;;  %v236_v0 = vld [vmem:[#allocation6 + $0x80] sm:$0xff]  ;;  %v237_v1 = vld [vmem:[#allocation6 + $0x88] sm:$0xff]  ;;  %s618_s17 = sshll.u32 %s1108_s15, 7  ;;  %s626_s21 = sshll.u32 %s922_s12, 11 }
  0x5c   : > { %v220_v2 = vld [vmem:[#allocation6] sm:$0xff]  ;;  %v324_v3 = vpack.c.bf16 %v237_v1, %v236_v0  ;;  %v221_v4 = vld [vmem:[#allocation6 + $0x8] sm:$0xff]  ;;  %v238_v5 = vld [vmem:[#allocation6 + $0x90] sm:$0xff]  ;;  %s1155_s19 = scalar_lea.vmem [#allocation8], %s618_s17  ;;  %s1174_s7 = scalar_lea.hbm %s1231_s2, %s626_s21 }
  0x5d   : > { %v239_v6 = vld [vmem:[#allocation6 + $0x98] sm:$0xff]  ;;  %v316_v7 = vpack.c.bf16 %v221_v4, %v220_v2  ;;  %v222_v9 = vld [vmem:[#allocation6 + $0x10] sm:$0xff]  ;;  %v240_v11 = vld [vmem:[#allocation6 + $0xa0] sm:$0xff]  ;;  %s510_s4 = sshll.u32 %s1155_s19, 4  ;;  %s497_s12 = scalar_lea.sflag [#allocation5], %s1108_s15  ;;  %s1176_s4 = int_to_ptr.vmem [resolvable:$true] %s510_s4 }
  0x5e   : > { %v325_v8 = vpack.c.bf16 %v239_v6, %v238_v5  ;;  %v223_v10 = vld [vmem:[#allocation6 + $0x18] sm:$0xff]  ;;  %627 = vmatprep.subr.bf16.mxu0 %v324_v3  ;;  %691 = vmatprep.subr.bf16.mxu1 %v324_v3  ;;  %v241_v12 = vld [vmem:[#allocation6 + $0xa8] sm:$0xff]  ;;  %v224_v15 = vld [vmem:[#allocation6 + $0x20] sm:$0xff]  ;;  %s844_s27 = scalar_lea.vmem %s1176_s4, 2048  ;;  %s938_s23 = smov [#allocation8]  }
  0x5f   : > { %628 = vmatpush3.bf16.msra.mxu0 %v316_v7  ;;  %699 = vmatpush3.bf16.msra.mxu1 %v316_v7  ;;  %v317_v13 = vpack.c.bf16 %v223_v10, %v222_v9  ;;  %v326_v14 = vpack.c.bf16 %v241_v12, %v240_v11  ;;  %v225_v16 = vld [vmem:[#allocation6 + $0x28] sm:$0xff]  ;;  %v242_v17 = vld [vmem:[#allocation6 + $0xb0] sm:$0xff]  ;;  %v243_v18 = vld [vmem:[#allocation6 + $0xb8] sm:$0xff]  ;;  %p845_p4 = scmp.ne.s32.totalorder %s1176_s4, %s844_s27  ;;  %s848_s29 = sshll.u32 %s938_s23, 4  ;;  %s849_s29 = int_to_ptr.vmem [resolvable:$false] %s848_s29 }
  0x60   : > { %629 = vmatprep.subr.bf16.mxu0 %v325_v8  ;;  %692 = vmatprep.subr.bf16.mxu1 %v325_v8  ;;  %v318_v19 = vpack.c.bf16 %v225_v16, %v224_v15  ;;  %v327_v20 = vpack.c.bf16 %v243_v18, %v242_v17  ;;  %v226_v21 = vld [vmem:[#allocation6 + $0x30] sm:$0xff]  ;;  %v227_v22 = vld [vmem:[#allocation6 + $0x38] sm:$0xff]  ;;  %v244_v23 = vld [vmem:[#allocation6 + $0xc0] sm:$0xff]  ;;  %s850_s30 = scalar_lea.vmem %s849_s29, 4096  ;;  %p851_p12 = scmp.lt.s32.totalorder %s1176_s4, %s849_s29 }
  0x61   : > { %v245_v24 = vld [vmem:[#allocation6 + $0xc8] sm:$0xff]  ;;  %v271_v26 = vld [vmem:[%s1112_s24 + $0x18] sm:$0xff]  ;;  %v319_v29 = vpack.c.bf16 %v227_v22, %v226_v21  ;;  %v228_v33 = vld [vmem:[#allocation6 + $0x40] sm:$0xff]  ;;  %p846_p6 = pnand %p845_p4, %p1052_p10  ;;  %p852_p11 = scmp.lt.s32.totalorder %s850_s30, %s844_s27 }
  0x62   : > { %v269_v25 = vld [vmem:[%s1112_s24 + $0x8] sm:$0xff]  ;;  %v287_v28 = vld [vmem:[%s1112_s24 + $0x98] sm:$0xff]  ;;  %v328_v32 = vpack.c.bf16 %v245_v24, %v244_v23  ;;  %v246_v35 = vld [vmem:[#allocation6 + $0xd0] sm:$0xff] }
  0x63   : > { %630 = vmatpush3.bf16.msra.mxu0 %v317_v13  ;;  %700 = vmatpush3.bf16.msra.mxu1 %v317_v13  ;;  %v285_v27 = vld [vmem:[%s1112_s24 + $0x88] sm:$0xff]  ;;  %v301_v30 = vpack.c.bf16 %v271_v26, %v269_v25  ;;  %v247_v36 = vld [vmem:[#allocation6 + $0xd8] sm:$0xff]  ;;  %v230_v39 = vld [vmem:[#allocation6 + $0x50] sm:$0xff]  ;;  %p847_p8 = pneg %p846_p6  ;;  %p853_p0 = por %p852_p11, %p851_p12 }
  0x64   : > { %631 = vmatprep.subr.bf16.mxu0 %v326_v14  ;;  %693 = vmatprep.subr.bf16.mxu1 %v326_v14  ;;  %v309_v31 = vpack.c.bf16 %v287_v28, %v285_v27  ;;  %v229_v34 = vld [vmem:[#allocation6 + $0x48] sm:$0xff]  ;;  %v329_v38 = vpack.c.bf16 %v247_v36, %v246_v35  ;;  %v231_v40 = vld [vmem:[#allocation6 + $0x58] sm:$0xff]  ;;  %v248_v41 = vld [vmem:[#allocation6 + $0xe0] sm:$0xff] }
  0x65   : > { %364 = vmatprep.mubr.bf16.mxu0 %v301_v30  ;;  %v320_v37 = vpack.c.bf16 %v229_v34, %v228_v33  ;;  %v249_v42 = vld [vmem:[#allocation6 + $0xe8] sm:$0xff]  ;;  %v321_v43 = vpack.c.bf16 %v231_v40, %v230_v39  ;;  %v232_v45 = vld [vmem:[#allocation6 + $0x60] sm:$0xff]  ;;  %v250_v47 = vld [vmem:[#allocation6 + $0xf0] sm:$0xff]  ;;  %p854_p5 = pnand %p853_p0, %p847_p8 }
  0x66   : > { %396 = vmatprep.mubr.bf16.mxu1 %v309_v31  ;;  %v330_v44 = vpack.c.bf16 %v249_v42, %v248_v41  ;;  %v233_v46 = vld [vmem:[#allocation6 + $0x68] sm:$0xff]  ;;  %v251_v48 = vld [vmem:[#allocation6 + $0xf8] sm:$0xff]  ;;  %v234_v51 = vld [vmem:[#allocation6 + $0x70] sm:$0xff] }
  0x67   : > { %632 = vmatpush3.bf16.msra.mxu0 %v318_v19  ;;  %701 = vmatpush3.bf16.msra.mxu1 %v318_v19  ;;  %v322_v49 = vpack.c.bf16 %v233_v46, %v232_v45  ;;  %v331_v50 = vpack.c.bf16 %v251_v48, %v250_v47  ;;  %v235_v52 = vld [vmem:[#allocation6 + $0x78] sm:$0xff]  ;;  %v268_v53 = vld [vmem:[%s1112_s24] sm:$0xff]  ;;  %v270_v54 = vld [vmem:[%s1112_s24 + $0x10] sm:$0xff] }
  0x68   : > { %633 = vmatprep.subr.bf16.mxu0 %v327_v20  ;;  %694 = vmatprep.subr.bf16.mxu1 %v327_v20  ;;  %v323_v55 = vpack.c.bf16 %v235_v52, %v234_v51  ;;  %v284_v56 = vld [vmem:[%s1112_s24 + $0x80] sm:$0xff]  ;;  %v286_v57 = vld [vmem:[%s1112_s24 + $0x90] sm:$0xff]  ;;  %v273_v58 = vld [vmem:[%s1112_s24 + $0x28] sm:$0xff]  ;;  %v300_v62 = vpack.c.bf16 %v270_v54, %v268_v53 }
  0x69   : > { %v275_v59 = vld [vmem:[%s1112_s24 + $0x38] sm:$0xff]  ;;  %v289_v60 = vld [vmem:[%s1112_s24 + $0xa8] sm:$0xff]  ;;  %v308_v63 = vpack.c.bf16 %v286_v57, %v284_v56  ;;  %v272_v2 = vld [vmem:[%s1112_s24 + $0x20] sm:$0xff] }
  0x6a   : > { %v291_v61 = vld [vmem:[%s1112_s24 + $0xb8] sm:$0xff]  ;;  %v303_v0 = vpack.c.bf16 %v275_v59, %v273_v58  ;;  %v274_v3 = vld [vmem:[%s1112_s24 + $0x30] sm:$0xff]  ;;  %v288_v4 = vld [vmem:[%s1112_s24 + $0xa0] sm:$0xff] }
  0x6b   : > { %634 = vmatpush3.bf16.msra.mxu0 %v319_v29  ;;  %702 = vmatpush3.bf16.msra.mxu1 %v319_v29  ;;  %v311_v1 = vpack.c.bf16 %v291_v61, %v289_v60  ;;  %v290_v5 = vld [vmem:[%s1112_s24 + $0xb0] sm:$0xff]  ;;  %v277_v6 = vld [vmem:[%s1112_s24 + $0x48] sm:$0xff]  ;;  %v279_v7 = vld [vmem:[%s1112_s24 + $0x58] sm:$0xff]  ;;  %v302_v10 = vpack.c.bf16 %v274_v3, %v272_v2 }
  0x6c   : > { %635 = vmatprep.subr.bf16.mxu0 %v328_v32  ;;  %695 = vmatprep.subr.bf16.mxu1 %v328_v32  ;;  %v293_v8 = vld [vmem:[%s1112_s24 + $0xc8] sm:$0xff]  ;;  %v295_v9 = vld [vmem:[%s1112_s24 + $0xd8] sm:$0xff]  ;;  %v310_v11 = vpack.c.bf16 %v290_v5, %v288_v4  ;;  %v305_v12 = vpack.c.bf16 %v279_v7, %v277_v6  ;;  %v276_v14 = vld [vmem:[%s1112_s24 + $0x40] sm:$0xff] }
  0x6d   : > { %v313_v13 = vpack.c.bf16 %v295_v9, %v293_v8  ;;  %v278_v15 = vld [vmem:[%s1112_s24 + $0x50] sm:$0xff]  ;;  %v292_v16 = vld [vmem:[%s1112_s24 + $0xc0] sm:$0xff]  ;;  %v281_v18 = vld [vmem:[%s1112_s24 + $0x68] sm:$0xff] }
  0x6e   : > { %v294_v17 = vld [vmem:[%s1112_s24 + $0xd0] sm:$0xff]  ;;  %v283_v19 = vld [vmem:[%s1112_s24 + $0x78] sm:$0xff]  ;;  %v297_v20 = vld [vmem:[%s1112_s24 + $0xe8] sm:$0xff]  ;;  %v304_v22 = vpack.c.bf16 %v278_v15, %v276_v14 }
  0x6f   : > { %636 = vmatpush3.bf16.msra.mxu0 %v320_v37  ;;  %703 = vmatpush3.bf16.msra.mxu1 %v320_v37  ;;  %v299_v21 = vld [vmem:[%s1112_s24 + $0xf8] sm:$0xff]  ;;  %v312_v23 = vpack.c.bf16 %v294_v17, %v292_v16  ;;  %v307_v24 = vpack.c.bf16 %v283_v19, %v281_v18  ;;  %v280_v26 = vld [vmem:[%s1112_s24 + $0x60] sm:$0xff]  ;;  %v282_v27 = vld [vmem:[%s1112_s24 + $0x70] sm:$0xff] }
  0x70   : > { %637 = vmatprep.subr.bf16.mxu0 %v329_v38  ;;  %696 = vmatprep.subr.bf16.mxu1 %v329_v38  ;;  %v315_v25 = vpack.c.bf16 %v299_v21, %v297_v20  ;;  %v296_v28 = vld [vmem:[%s1112_s24 + $0xe0] sm:$0xff]  ;;  %v298_v29 = vld [vmem:[%s1112_s24 + $0xf0] sm:$0xff]  ;;  %v306_v30 = vpack.c.bf16 %v282_v27, %v280_v26 }
  0x71   : > { %v314_v31 = vpack.c.bf16 %v298_v29, %v296_v28 }
  0x73   : > { %638 = vmatpush3.bf16.msra.mxu0 %v321_v43  ;;  %704 = vmatpush3.bf16.msra.mxu1 %v321_v43 }
  0x74   : > { %639 = vmatprep.subr.bf16.mxu0 %v330_v44  ;;  %697 = vmatprep.subr.bf16.mxu1 %v330_v44 }
  0x77   : > { %640 = vmatpush3.bf16.msra.mxu0 %v322_v49  ;;  %705 = vmatpush3.bf16.msra.mxu1 %v322_v49 }
  0x78   : > { %641 = vmatprep.subr.bf16.mxu0 %v331_v50  ;;  %698 = vmatprep.subr.bf16.mxu1 %v331_v50 }
  0x7b   : > { %642 = vmatpush3.bf16.msra.mxu0 %v323_v55  ;;  %706 = vmatpush3.bf16.msra.mxu1 %v323_v55 }
  0x7e   : > { %365 = vmatmul.mubr.bf16.vlgmr.msra.gmra.mrb[0].mxu0 %v300_v62  ;;  %397 = vmatmul.mubr.bf16.vlgmr.msra.gmra.mrb[0].mxu1 %v308_v63 }
  0x7f   : > { %372 = vmatprep.mubr.bf16.mxu0 %v303_v0  ;;  %404 = vmatprep.mubr.bf16.mxu1 %v311_v1 }
  0x86   : > { %373 = vmatmul.mubr.bf16.gmra.mrb[4].mxu0 %v302_v10  ;;  %405 = vmatmul.mubr.bf16.gmra.mrb[4].mxu1 %v310_v11 }
  0x87   : > { %380 = vmatprep.mubr.bf16.mxu0 %v305_v12  ;;  %412 = vmatprep.mubr.bf16.mxu1 %v313_v13 }
  0x8e   : > { %381 = vmatmul.mubr.bf16.gmra.mrb[8].mxu0 %v304_v22  ;;  %413 = vmatmul.mubr.bf16.gmra.mrb[8].mxu1 %v312_v23 }
  0x8f   : > { %388 = vmatprep.mubr.bf16.mxu0 %v307_v24  ;;  %420 = vmatprep.mubr.bf16.mxu1 %v315_v25 }
  0x96   : > { %389 = vmatmul.mubr.bf16.gmra.mrb[12].mxu0 %v306_v30  ;;  %421 = vmatmul.mubr.bf16.gmra.mrb[12].mxu1 %v314_v31 }
 0x151   : > { %v643_v32 = vpop.f32.mrb[0].mxu0  ;;  %v667_v33 = vpop.f32.mrb[0].mxu1 }
 0x152   : > { %v644_v34 = vpop.f32.mrb[1].mxu0  ;;  %v668_v35 = vpop.f32.mrb[1].mxu1 }
 0x153   : > { %v645_v36 = vadd.f32 %v644_v34, %v643_v32  ;;  %v669_v37 = vadd.f32 %v668_v35, %v667_v33  ;;  %v646_v38 = vpop.f32.mrb[2].mxu0  ;;  %v670_v39 = vpop.f32.mrb[2].mxu1 }
 0x154   : > { %v647_v40 = vpop.f32.mrb[3].mxu0  ;;  %v671_v41 = vpop.f32.mrb[3].mxu1 }
 0x155   : > { %480 = vst [vmem:[%s1155_s19] sm:$0xff] %v645_v36  ;;  %488 = vst [vmem:[%s1155_s19 + $0x40] sm:$0xff] %v669_v37  ;;  %v648_v42 = vadd.f32 %v647_v40, %v646_v38  ;;  %v672_v43 = vadd.f32 %v671_v41, %v670_v39 }
 0x157   : > { %481 = vst [vmem:[%s1155_s19 + $0x8] sm:$0xff] %v648_v42  ;;  %489 = vst [vmem:[%s1155_s19 + $0x48] sm:$0xff] %v672_v43 }
 0x159   : > { %v649_v44 = vpop.f32.mrb[4].mxu0  ;;  %v673_v45 = vpop.f32.mrb[4].mxu1 }
 0x15a   : > { %v650_v46 = vpop.f32.mrb[5].mxu0  ;;  %v674_v47 = vpop.f32.mrb[5].mxu1 }
 0x15b   : > { %v651_v48 = vadd.f32 %v650_v46, %v649_v44  ;;  %v675_v49 = vadd.f32 %v674_v47, %v673_v45  ;;  %v652_v50 = vpop.f32.mrb[6].mxu0  ;;  %v676_v51 = vpop.f32.mrb[6].mxu1 }
 0x15c   : > { %v653_v52 = vpop.f32.mrb[7].mxu0  ;;  %v677_v53 = vpop.f32.mrb[7].mxu1 }
 0x15d   : > { %482 = vst [vmem:[%s1155_s19 + $0x10] sm:$0xff] %v651_v48  ;;  %490 = vst [vmem:[%s1155_s19 + $0x50] sm:$0xff] %v675_v49  ;;  %v654_v54 = vadd.f32 %v653_v52, %v652_v50  ;;  %v678_v55 = vadd.f32 %v677_v53, %v676_v51 }
 0x15f   : > { %483 = vst [vmem:[%s1155_s19 + $0x18] sm:$0xff] %v654_v54  ;;  %491 = vst [vmem:[%s1155_s19 + $0x58] sm:$0xff] %v678_v55 }
 0x161   : > { %v655_v56 = vpop.f32.mrb[8].mxu0  ;;  %v679_v57 = vpop.f32.mrb[8].mxu1 }
 0x162   : > { %v656_v58 = vpop.f32.mrb[9].mxu0  ;;  %v680_v59 = vpop.f32.mrb[9].mxu1 }
 0x163   : > { %v657_v60 = vadd.f32 %v656_v58, %v655_v56  ;;  %v681_v61 = vadd.f32 %v680_v59, %v679_v57  ;;  %v658_v62 = vpop.f32.mrb[10].mxu0  ;;  %v682_v63 = vpop.f32.mrb[10].mxu1 }
 0x164   : > { %v659_v0 = vpop.f32.mrb[11].mxu0  ;;  %v683_v1 = vpop.f32.mrb[11].mxu1 }
 0x165   : > { %484 = vst [vmem:[%s1155_s19 + $0x20] sm:$0xff] %v657_v60  ;;  %492 = vst [vmem:[%s1155_s19 + $0x60] sm:$0xff] %v681_v61  ;;  %v660_v2 = vadd.f32 %v659_v0, %v658_v62  ;;  %v684_v3 = vadd.f32 %v683_v1, %v682_v63 }
 0x167   : > { %485 = vst [vmem:[%s1155_s19 + $0x28] sm:$0xff] %v660_v2  ;;  %493 = vst [vmem:[%s1155_s19 + $0x68] sm:$0xff] %v684_v3 }
 0x169   : > { %v661_v4 = vpop.f32.mrb[12].mxu0  ;;  %v685_v5 = vpop.f32.mrb[12].mxu1 }
 0x16a   : > { %v662_v6 = vpop.f32.mrb[13].mxu0  ;;  %v686_v7 = vpop.f32.mrb[13].mxu1 }
 0x16b   : > { %v663_v8 = vadd.f32 %v662_v6, %v661_v4  ;;  %v687_v9 = vadd.f32 %v686_v7, %v685_v5  ;;  %v664_v10 = vpop.f32.mrb[14].mxu0  ;;  %v688_v11 = vpop.f32.mrb[14].mxu1 }
 0x16c   : > { %v665_v12 = vpop.f32.mrb[15].mxu0  ;;  %v689_v13 = vpop.f32.mrb[15].mxu1 }
 0x16d   : > { %486 = vst [vmem:[%s1155_s19 + $0x30] sm:$0xff] %v663_v8  ;;  %494 = vst [vmem:[%s1155_s19 + $0x70] sm:$0xff] %v687_v9  ;;  %v666_v14 = vadd.f32 %v665_v12, %v664_v10  ;;  %v690_v15 = vadd.f32 %v689_v13, %v688_v11 }
 0x16f   : > { %487 = vst [vmem:[%s1155_s19 + $0x38] sm:$0xff] %v666_v14  ;;  %495 = vst [vmem:[%s1155_s19 + $0x78] sm:$0xff] %v690_v15 }
 0x170   : > { %857 = shalt.err (!%p854_p5)
}
 0x171   : > { %s858_s3 = scalar_lea.hbm %s1174_s7, 2048  ;;  %s862_s16 = scalar_lea.hbm %s1231_s2, 4096 }
 0x172   : > { %p859_p9 = scmp.ne.s32.totalorder %s1174_s7, %s858_s3  ;;  %p863_p3 = scmp.lt.u32.totalorder %s1174_s7, %s1231_s2 }
 0x173   : > { %p864_p7 = scmp.lt.u32.totalorder %s862_s16, %s858_s3  ;;  %p866_p4 = scmp.lt.u32.totalorder %s858_s3, %s1174_s7 }
 0x174   : > { %p860_p1 = pnand %p859_p9, %p1052_p10 }
 0x175   : > { %p865_p13 = por %p864_p7, %p863_p3 }
 0x176   : > { %p861_p2 = pneg %p860_p1 }
 0x177   : > { %p867_p6 = por %p866_p4, %p865_p13 }
 0x179   : > { %p868_p8 = pnand %p867_p6, %p861_p2 }
 0x17b   : > { %871 = shalt.err (!%p868_p8)
}
 0x17c   : > { %s939_s17 = smov 128   ;;  %s940_s19 = smov 8  }
 0x17d   : > { %713 = dma.vmem_to_hbm [thread:$0]  (%p1052_p10), %s1176_s4, 2048, %s1174_s7, %s497_s12, %s939_s17, %s939_s17, %s940_s19  }
 0x17e PF: > { %s525_s21 = sand.u32 1, %s910_s9   ;;  %p1249_p12 = scmp.ne.s32.totalorder %s1239_s20, 0 }
 0x17f   : > { %p1250_p11 = scmp.ge.s32.totalorder %s930_s14, 2  ;;  %s526_s5 = scalar_lea.sflag [#allocation5], %s525_s21 }
 0x181   : > { %p724_p0 = pnand %p1250_p11, %p1249_p12 }
 0x183   : > { %905 = dma.done.wait (!%p724_p0), %s526_s5, 2048  }
 0x184   : > { %907 = vsyncadd (!%p724_p0), %s526_s5, 4294965248  ;;  %s19_s14 = sadd.s32 1, %s930_s14   ;;  %s1251_s9 = smov %s914_s10 }
 0x185   : > { %p16_p5 = scmp.ge.s32.totalorder %s19_s14, 4   ;;  %s1252_s10 = smov %s918_s11 }
 0x186   : > { %s1253_s11 = smov %s1061_s28  ;;  %s1254_s12 = smov %s926_s13 }
 0x187   : > { %s1255_s13 = smov %s1257_s25  ;;  %18 = sbr.rel (!%p16_p5) target bundleno = 7 (0x7), region = 86 }
 0x18e   :  { %531 = vsyncpa [#allocation4], 1 }
 0x18f   :  { %533 = vsyncpa [#allocation4 + $0x1], 1 }
 0x190   :  { %534 = vsyncpa [#allocation7], 1 }
 0x191   :  { %535 = vsyncpa [#allocation5], 1 }
 0x192   :  { %537 = vsyncpa [#allocation5 + $0x1], 1 }

</bundles_post_ra>
